<compile_context>
chip_gen: v7x
topology: tpu7x:2x2x1
jax: 0.10.0
libtpu: 0.0.40
codegen_flags: <defaults>
</compile_context>

<pallas_src>
import jax
import jax.numpy as jnp
from jax import lax
from jax.experimental import pallas as pl
from jax.experimental.pallas import tpu as pltpu


def _center_loss_kernel(x_ref, c_ref, lbl_ref, dist_ref):
    # x_ref:    (TB, D)  feature slab for this grid step.
    # c_ref:    (C, D)   all class centers, resident in VMEM across steps.
    # lbl_ref:  (TB, 1)  int32 labels for this slab.
    # dist_ref: (TB, 1)  per-row clipped squared distance (output).
    x = x_ref[...].astype(jnp.float32)
    centers = c_ref[...].astype(jnp.float32)
    labels = lbl_ref[...]                                    # (TB, 1) int32

    tb = x.shape[0]
    num_classes = centers.shape[0]

    # In-kernel gather of each row's center via a one-hot matmul on the MXU.
    # Exact: exactly one term per output element is nonzero.
    class_ids = lax.broadcasted_iota(jnp.int32, (tb, num_classes), 1)
    one_hot = (class_ids == labels).astype(jnp.float32)      # (TB, C)
    gathered = jnp.dot(one_hot, centers,
                       preferred_element_type=jnp.float32)   # (TB, D)

    diff = x - gathered
    dist = jnp.sum(diff * diff, axis=-1, keepdims=True)      # (TB, 1)
    dist_ref[...] = jnp.clip(dist, 1e-12, 1e12)              # per-sample clamp


def center_loss(x, centers, labels, *, max_tile=1024):
    """x: (B, D), centers: (C, D), labels: (B,) int -> scalar f32 loss."""
    B, D = x.shape
    C, Dc = centers.shape
    assert D == Dc, (D, Dc)
    # TODO(synk): for very large C (centers no longer fit VMEM), pre-gather
    # centers[labels] in the wrapper (XLA gather) and stream a two-input
    # (x, gathered) tiled kernel instead of keeping centers resident.

    # Batch tile: TB == B (full extent, always legal) for small batches,
    # otherwise a multiple-of-8 tile. The last partial tile is handled by
    # Pallas edge-block padding; its out-of-range output rows are discarded.
    if B <= max_tile:
        tb = B
    else:
        tb = (max_tile // 8) * 8
    num_tiles = pl.cdiv(B, tb)

    labels2 = labels.astype(jnp.int32).reshape(B, 1)

    dist = pl.pallas_call(
        _center_loss_kernel,
        out_shape=jax.ShapeDtypeStruct((B, 1), jnp.float32),
        grid=(num_tiles,),
        in_specs=[
            pl.BlockSpec((tb, D), lambda i: (i, 0)),   # stream feature slabs
            pl.BlockSpec((C, D), lambda i: (0, 0)),    # centers resident in VMEM
            pl.BlockSpec((tb, 1), lambda i: (i, 0)),   # labels per slab
        ],
        out_specs=pl.BlockSpec((tb, 1), lambda i: (i, 0)),
        compiler_params=pltpu.CompilerParams(
            # Tiles are independent -> megacore sharding on v7x.
            dimension_semantics=("parallel",)),
    )(x, centers, labels2)
    return jnp.mean(dist)


def _center_loss_ref(x, centers, labels):
    # Pure-JAX reference mirroring the PyTorch module: squared distance of each
    # sample to its own class center, clamped to [1e-12, 1e12], then averaged.
    gathered = centers[labels]                       # (B, D)
    d = jnp.sum((x - gathered) ** 2, axis=1)         # (B,)
    d = jnp.clip(d, 1e-12, 1e12)
    return jnp.mean(d)


if __name__ == "__main__":
    key = jax.random.PRNGKey(0)
    kx, kc, kl, kx2, kc2, kl2 = jax.random.split(key, 6)

    # Module-default shapes (small): num_classes=40, feat_dim=1024, batch=8.
    num_classes, feat_dim, batch = 40, 1024, 8
    x = jax.random.normal(kx, (batch, feat_dim), dtype=jnp.float32)
    centers = jax.random.normal(kc, (num_classes, feat_dim), dtype=jnp.float32)
    labels = jax.random.randint(kl, (batch,), 0, num_classes, dtype=jnp.int32)

    loss = jax.block_until_ready(center_loss(x, centers, labels))
    ref = _center_loss_ref(x, centers, labels)
    assert jnp.allclose(loss, ref, rtol=1e-5, atol=1e-5), (loss, ref)

    # Exercise the batch-tiled path with a partial last tile
    # (B=50, TB=16 -> grid=4, last tile has 2 valid rows).
    x2 = jax.random.normal(kx2, (50, 256), dtype=jnp.float32)
    centers2 = jax.random.normal(kc2, (12, 256), dtype=jnp.float32)
    labels2 = jax.random.randint(kl2, (50,), 0, 12, dtype=jnp.int32)

    loss2 = jax.block_until_ready(center_loss(x2, centers2, labels2, max_tile=16))
    ref2 = _center_loss_ref(x2, centers2, labels2)
    assert jnp.allclose(loss2, ref2, rtol=1e-5, atol=1e-5), (loss2, ref2)

    print("KERNEL_OK")
</pallas_src>

<mosaic_0001>
module attributes {stable_mosaic.version = 11 : i64} {
  func.func @_center_loss_kernel(%arg0: i32, %arg1: memref<8x1024xf32, #tpu.memory_space<vmem>>, %arg2: memref<40x1024xf32, #tpu.memory_space<vmem>>, %arg3: memref<8x1xi32, #tpu.memory_space<vmem>>, %arg4: memref<8x1xf32, #tpu.memory_space<vmem>>) attributes {dimension_semantics = [#tpu.dimension_semantics<parallel>], iteration_bounds = array<i64: 1>, scalar_prefetch = 0 : i64, scratch_operands = 0 : i64, tpu.core_type = #tpu.core_type<tc>, window_params = [{transform_indices = @transform_0, window_bounds = array<i64: 8, 1024>}, {pipeline_mode = #tpu.pipeline_mode<synchronous>, transform_indices = @transform_1, window_bounds = array<i64: 40, 1024>}, {transform_indices = @transform_2, window_bounds = array<i64: 8, 1>}, {transform_indices = @transform_3, window_bounds = array<i64: 8, 1>}]} {
    %c0 = arith.constant 0 : index
    %c0_0 = arith.constant 0 : index
    %0 = vector.load %arg1[%c0, %c0_0] : memref<8x1024xf32, #tpu.memory_space<vmem>>, vector<8x1024xf32>
    %c0_1 = arith.constant 0 : index
    %c0_2 = arith.constant 0 : index
    %1 = vector.load %arg2[%c0_1, %c0_2] : memref<40x1024xf32, #tpu.memory_space<vmem>>, vector<40x1024xf32>
    %c0_3 = arith.constant 0 : index
    %c0_4 = arith.constant 0 : index
    %2 = vector.load %arg3[%c0_3, %c0_4] : memref<8x1xi32, #tpu.memory_space<vmem>>, vector<8x1xi32>
    %3 = tpu.iota {dimensions = array<i32: 1>} : vector<8x40xi32>
    %4 = vector.broadcast %2 : vector<8x1xi32> to vector<8x40xi32>
    %5 = arith.cmpi eq, %3, %4 : vector<8x40xi32>
    %6 = arith.extui %5 : vector<8x40xi1> to vector<8x40xi32>
    %7 = arith.sitofp %6 : vector<8x40xi32> to vector<8x40xf32>
    %cst = arith.constant dense<0.000000e+00> : vector<8x1024xf32>
    %8 = tpu.matmul %7, %1, %cst {dimension_numbers = #tpu.dot_dimension_numbers<[1], [0], [0], [1], [0, 0, 1, 1], [], []>} : vector<8x40xf32>, vector<40x1024xf32>, vector<8x1024xf32> -> vector<8x1024xf32>
    %9 = arith.subf %0, %8 : vector<8x1024xf32>
    %10 = arith.mulf %9, %9 : vector<8x1024xf32>
    %cst_5 = arith.constant dense<0.000000e+00> : vector<8xf32>
    %11 = vector.multi_reduction <add>, %10, %cst_5 [1] : vector<8x1024xf32> to vector<8xf32>
    %12 = vector.shape_cast %11 : vector<8xf32> to vector<8x1xf32>
    %cst_6 = arith.constant 9.99999996E-13 : f32
    %cst_7 = arith.constant 9.99999995E+11 : f32
    %13 = vector.broadcast %cst_6 : f32 to vector<8x1xf32>
    %14 = arith.maximumf %13, %12 : vector<8x1xf32>
    %15 = vector.broadcast %cst_7 : f32 to vector<8x1xf32>
    %16 = arith.minimumf %15, %14 : vector<8x1xf32>
    %c0_8 = arith.constant 0 : index
    %c0_9 = arith.constant 0 : index
    %17 = vector.load %arg4[%c0_8, %c0_9] : memref<8x1xf32, #tpu.memory_space<vmem>>, vector<8x1xf32>
    tpu.vector_store %arg4[%c0_8, %c0_9], %16 {strides = array<i32>} : memref<8x1xf32, #tpu.memory_space<vmem>>, vector<8x1xf32>,
    return
  }
  func.func @transform_0(%arg0: i32) -> (i32, i32) {
    %c0_i32 = arith.constant 0 : i32
    %c0_i32_0 = arith.constant 0 : i32
    return %arg0, %c0_i32 : i32, i32
  }
  func.func @transform_1(%arg0: i32) -> (i32, i32) {
    %c0_i32 = arith.constant 0 : i32
    %c0_i32_0 = arith.constant 0 : i32
    %c0_i32_1 = arith.constant 0 : i32
    return %c0_i32, %c0_i32_0 : i32, i32
  }
  func.func @transform_2(%arg0: i32) -> (i32, i32) {
    %c0_i32 = arith.constant 0 : i32
    %c0_i32_0 = arith.constant 0 : i32
    return %arg0, %c0_i32 : i32, i32
  }
  func.func @transform_3(%arg0: i32) -> (i32, i32) {
    %c0_i32 = arith.constant 0 : i32
    %c0_i32_0 = arith.constant 0 : i32
    return %arg0, %c0_i32 : i32, i32
  }
}

</mosaic_0001>

<bundles_post_ra>
// kernel: tpu_custom_call.1
= control target key start
LH: loop header
LB: loop body
LE: loop exit
PB: predicated region body
PF: predicated region fallthrough
CT: control target
= control target key end

     0   :  { %8 = vsyncpa [#allocation3], 0  ;;  %s584_s0 = inlined_call_operand.hbm [shape: f32[8,1024], index: 0, kind: input, shape index: {}]   ;;  %s585_s1 = inlined_call_operand.hbm [shape: f32[40,1024], index: 1, kind: input, shape index: {}]   ;;  %s586_s2 = inlined_call_operand.vmem [shape: s32[8,1], index: 2, kind: input, shape index: {}]   ;;  %s587_s3 = inlined_call_operand.vmem [shape: f32[8,1], index: 3, kind: output, shape index: {}]  }
   0x1   :  { %9 = vsyncpa [#allocation5], 0  ;;  %s512_s12 = smov [#allocation2]   ;;  %s513_s14 = smov [#allocation4]  }
   0x2   :  { %s16_s13 = sshll.u32 %s512_s12, 4  ;;  %s25_s15 = sshll.u32 %s513_s14, 4  ;;  %s17_s13 = int_to_ptr.vmem [resolvable:$true] %s16_s13  ;;  %s538_s15 = int_to_ptr.vmem [resolvable:$true] %s25_s15 }
   0x3   :  { %s464_s18 = scalar_lea.hbm %s584_s0, 1024 }
   0x4   :  { %p465_p0 = scmp.ne.s32.totalorder %s584_s0, %s464_s18  ;;  %p468_p1 = scmp.lt.u32.totalorder %s464_s18, %s584_s0 }
   0x6   :  { %p470_p2 = pnand %p468_p1, %p465_p0 }
   0x8   :  { %473 = shalt.err (!%p470_p2)
}
   0x9   :  { %s474_s23 = scalar_lea.vmem %s17_s13, 1024  ;;  %p479_p4 = scmp.lt.s32.totalorder %s17_s13, %s17_s13 }
   0xa   :  { %p475_p3 = scmp.ne.s32.totalorder %s17_s13, %s474_s23  ;;  %p480_p5 = scmp.lt.s32.totalorder %s474_s23, %s474_s23 }
   0xc   :  { %p481_p6 = por %p480_p5, %p479_p4 }
   0xe   :  { %p482_p7 = pnand %p481_p6, %p475_p3 }
  0x10   :  { %485 = shalt.err (!%p482_p7)
}
  0x11   :  { %19 = dma.hbm_to_vmem [thread:$0]  %s584_s0, 1024, %s17_s13, [#allocation3]  }
  0x12   :  { %s486_s28 = scalar_lea.hbm %s585_s1, 5120 }
  0x13   :  { %p487_p8 = scmp.ne.s32.totalorder %s585_s1, %s486_s28  ;;  %p490_p9 = scmp.lt.u32.totalorder %s486_s28, %s585_s1 }
  0x15   :  { %p492_p10 = pnand %p490_p9, %p487_p8 }
  0x17   :  { %495 = shalt.err (!%p492_p10)
}
  0x18   :  { %s496_s6 = scalar_lea.vmem %s538_s15, 5120  ;;  %p501_p12 = scmp.lt.s32.totalorder %s538_s15, %s538_s15 }
  0x19   :  { %p497_p11 = scmp.ne.s32.totalorder %s538_s15, %s496_s6  ;;  %p502_p13 = scmp.lt.s32.totalorder %s496_s6, %s496_s6 }
  0x1b   :  { %p503_p0 = por %p502_p13, %p501_p12 }
  0x1d   :  { %p504_p1 = pnand %p503_p0, %p497_p11 }
  0x1f   :  { %507 = shalt.err (!%p504_p1)
}
  0x20   :  { %s514_s0 = smov 1024   ;;  %s515_s7 = smov 64  }
  0x21   :  { %31 = dma.hbm_to_vmem [thread:$0]  %s585_s1, 5120, %s538_s15, [#allocation5], %s514_s0, %s514_s0, %s515_s7  }
  0x22   :  { %508 = dma.done.wait [#allocation3], 1024  }
  0x23   :  { %509 = vsyncadd [#allocation3], 4294966272 }
  0x24   :  { %510 = dma.done.wait [#allocation5], 5120  }
  0x25   :  { %511 = vsyncadd [#allocation5], 4294962176  ;;  %v516_v0 = vmov 0   ;;  %v517_v1 = vmov 0.0   ;;  %v88_v2 = vld [vmem:[%s586_s2] sm:$0xff]  ;;  %v49_v3 = vld [vmem:[#allocation4 + $0x8] sm:$0xff]  ;;  %v89_v37 = vlaneseq }
  0x26   :  { %463 = vset.pattern.permute.xlu0 %v516_v0  ;;  %165 = vmatprep.mubr.f32.mxu0 %v517_v1  ;;  %v57_v4 = vld [vmem:[#allocation4 + $0x48] sm:$0xff]  ;;  %v51_v6 = vld [vmem:[#allocation4 + $0x18] sm:$0xff]  ;;  %v48_v8 = vld [vmem:[#allocation4] sm:$0xff]  ;;  %vm97_vm0 = vcmask 326656   ;;  %vm412_vm2 = vcmask 7168  }
  0x27   :  { %236 = vmatprep.mubr.f32.mxu1 %v517_v1  ;;  %92 = vperm.xlu0 %463, %v88_v2   ;;  %v425_v5 = vpack.c.bf16 %v57_v4, %v49_v3  ;;  %v59_v7 = vld [vmem:[#allocation4 + $0x58] sm:$0xff]  ;;  %v56_v10 = vld [vmem:[#allocation4 + $0x40] sm:$0xff]  ;;  %v50_v11 = vld [vmem:[#allocation4 + $0x10] sm:$0xff]  ;;  %v90_v40 = vand.u32 127, %v89_v37 }
  0x28   :  { %v433_v9 = vpack.c.bf16 %v59_v7, %v51_v6  ;;  %v58_v12 = vld [vmem:[#allocation4 + $0x50] sm:$0xff]  ;;  %v427_v13 = vpack.c.bf16 %v56_v10, %v48_v8  ;;  %v65_v15 = vld [vmem:[#allocation4 + $0x88] sm:$0xff]  ;;  %v67_v17 = vld [vmem:[#allocation4 + $0x98] sm:$0xff] }
  0x29   :  { %426 = vmatprep.subr.bf16.mxu0 %v425_v5  ;;  %v435_v14 = vpack.c.bf16 %v58_v12, %v50_v11  ;;  %v73_v16 = vld [vmem:[#allocation4 + $0xc8] sm:$0xff]  ;;  %v75_v19 = vld [vmem:[#allocation4 + $0xd8] sm:$0xff]  ;;  %v64_v20 = vld [vmem:[#allocation4 + $0x80] sm:$0xff] }
  0x2a   :  { %434 = vmatprep.subr.bf16.mxu1 %v433_v9  ;;  %v429_v18 = vpack.c.bf16 %v73_v16, %v65_v15  ;;  %v72_v21 = vld [vmem:[#allocation4 + $0xc0] sm:$0xff]  ;;  %428 = vmatpush1.bf16.msra.mxu0 %v427_v13  ;;  %v437_v22 = vpack.c.bf16 %v75_v19, %v67_v17  ;;  %v66_v24 = vld [vmem:[#allocation4 + $0x90] sm:$0xff]  ;;  %v81_v27 = vld [vmem:[#allocation4 + $0x108] sm:$0xff] }
  0x2b   :  { %436 = vmatpush1.bf16.msra.mxu1 %v435_v14  ;;  %v431_v23 = vpack.c.bf16 %v72_v21, %v64_v20  ;;  %v74_v25 = vld [vmem:[#allocation4 + $0xd0] sm:$0xff]  ;;  %v83_v28 = vld [vmem:[#allocation4 + $0x118] sm:$0xff]  ;;  %v53_v29 = vld [vmem:[#allocation4 + $0x28] sm:$0xff] }
  0x2c   :  { %430 = vmatprep.subr.bf16.mxu0 %v429_v18  ;;  %v439_v26 = vpack.c.bf16 %v74_v25, %v66_v24  ;;  %438 = vmatprep.subr.bf16.mxu1 %v437_v22  ;;  %v61_v30 = vld [vmem:[#allocation4 + $0x68] sm:$0xff]  ;;  %v55_v31 = vld [vmem:[#allocation4 + $0x38] sm:$0xff]  ;;  %v80_v33 = vld [vmem:[#allocation4 + $0x100] sm:$0xff] }
  0x2d   :  { %v63_v32 = vld [vmem:[#allocation4 + $0x78] sm:$0xff]  ;;  %v82_v34 = vld [vmem:[#allocation4 + $0x110] sm:$0xff]  ;;  %v441_v35 = vpack.c.bf16 %v61_v30, %v53_v29  ;;  %v52_v38 = vld [vmem:[#allocation4 + $0x20] sm:$0xff] }
  0x2e   :  { %432 = vmatpush1.bf16.msra.mxu0 %v431_v23  ;;  %v449_v36 = vpack.c.bf16 %v63_v32, %v55_v31  ;;  %v60_v39 = vld [vmem:[#allocation4 + $0x60] sm:$0xff]  ;;  %v54_v41 = vld [vmem:[#allocation4 + $0x30] sm:$0xff]  ;;  %v69_v43 = vld [vmem:[#allocation4 + $0xa8] sm:$0xff] }
  0x2f   :  { %440 = vmatpush1.bf16.msra.mxu1 %v439_v26  ;;  %109 = vmatprep.subr.mxu0 %v81_v27  ;;  %v62_v42 = vld [vmem:[#allocation4 + $0x70] sm:$0xff]  ;;  %v77_v44 = vld [vmem:[#allocation4 + $0xe8] sm:$0xff]  ;;  %v71_v45 = vld [vmem:[#allocation4 + $0xb8] sm:$0xff]  ;;  %v443_v48 = vpack.c.bf16 %v60_v39, %v52_v38 }
  0x30   :  { %180 = vmatprep.subr.mxu1 %v83_v28  ;;  %v79_v46 = vld [vmem:[#allocation4 + $0xf8] sm:$0xff]  ;;  %v451_v49 = vpack.c.bf16 %v62_v42, %v54_v41  ;;  %v68_v50 = vld [vmem:[#allocation4 + $0xa0] sm:$0xff]  ;;  %v445_v51 = vpack.c.bf16 %v77_v44, %v69_v43  ;;  %v70_v54 = vld [vmem:[#allocation4 + $0xb0] sm:$0xff] }
  0x31   :  { %v453_v52 = vpack.c.bf16 %v79_v46, %v71_v45  ;;  %v76_v53 = vld [vmem:[#allocation4 + $0xe0] sm:$0xff]  ;;  %v78_v55 = vld [vmem:[#allocation4 + $0xf0] sm:$0xff]  ;;  %v85_v59 = vld [vmem:[#allocation4 + $0x128] sm:$0xff] }
  0x32   :  { %110 = vmatpush1.msra.mxu0 %v80_v33  ;;  %v447_v57 = vpack.c.bf16 %v76_v53, %v68_v50  ;;  %v455_v58 = vpack.c.bf16 %v78_v55, %v70_v54  ;;  %v87_v60 = vld [vmem:[#allocation4 + $0x138] sm:$0xff]  ;;  %v84_v61 = vld [vmem:[#allocation4 + $0x120] sm:$0xff]  ;;  %v86_v62 = vld [vmem:[#allocation4 + $0x130] sm:$0xff] }
  0x33   :  { %181 = vmatpush1.msra.mxu1 %v82_v34  ;;  %442 = vmatprep.subr.bf16.mxu0 %v441_v35  ;;  %v40_v63 = vld [vmem:[#allocation2] sm:$0xff]  ;;  %v42_v0 = vld [vmem:[#allocation2 + $0x10] sm:$0xff]  ;;  %v41_v2 = vld [vmem:[#allocation2 + $0x8] sm:$0xff] }
  0x34   :  { %450 = vmatprep.subr.bf16.mxu1 %v449_v36  ;;  %v44_v17 = vld [vmem:[#allocation2 + $0x20] sm:$0xff]  ;;  %v45_v18 = vld [vmem:[#allocation2 + $0x28] sm:$0xff]  ;;  %v46_v21 = vld [vmem:[#allocation2 + $0x30] sm:$0xff] }
  0x35   :  { %v47_v27 = vld [vmem:[#allocation2 + $0x38] sm:$0xff] }
  0xa6   :  { %v93_v47 = vpop.permute.xlu0 %92 }
  0xa7   :  { %vm94_vm1 = vcmp.eq.s32.totalorder %v90_v40, %v93_v47 }
  0xa8   :  { %v420_v56 = vsel %vm94_vm1, 1.0, %v517_v1 }
  0xa9   :  { %421 = vmatmul.mubr.msk.f32.vlgmr.msra.gmra.mrb[0].mxu0 %vm97_vm0, %v420_v56  ;;  %422 = vmatmul.mubr.msk.f32.vlgmr.msra.gmra.mrb[0].mxu1 %vm97_vm0, %v420_v56 }
  0xaa   :  { %444 = vmatpush1.bf16.msra.mxu0 %v443_v48  ;;  %452 = vmatpush1.bf16.msra.mxu1 %v451_v49 }
  0xab   :  { %446 = vmatprep.subr.bf16.mxu0 %v445_v51  ;;  %454 = vmatprep.subr.bf16.mxu1 %v453_v52 }
  0xac   :  { %307 = vmatprep.mubr.f32.mxu0 %v517_v1  ;;  %378 = vmatprep.mubr.f32.mxu1 %v517_v1  ;;  %v43_v1 = vld [vmem:[#allocation2 + $0x18] sm:$0xff] }
  0xae   :  { %448 = vmatpush1.bf16.msra.mxu0 %v447_v57  ;;  %456 = vmatpush1.bf16.msra.mxu1 %v455_v58 }
  0xaf   :  { %251 = vmatprep.subr.mxu0 %v85_v59  ;;  %322 = vmatprep.subr.mxu1 %v87_v60 }
  0xb2   :  { %252 = vmatpush1.msra.mxu0 %v84_v61  ;;  %323 = vmatpush1.msra.mxu1 %v86_v62 }
  0xb3   :  { %423 = vmatmul.mubr.msk.f32.vlgmr.msra.gmra.mrb[2].mxu0 %vm97_vm0, %v420_v56  ;;  %424 = vmatmul.mubr.msk.f32.vlgmr.msra.gmra.mrb[2].mxu1 %vm97_vm0, %v420_v56 }
 0x17c   :  { %v167_v3 = vpop.f32.mrb[0].mxu0  ;;  %v238_v4 = vpop.f32.mrb[0].mxu1 }
 0x17d   :  { %v385_v5 = vsub.f32 %v40_v63, %v167_v3  ;;  %v169_v6 = vpop.f32.mrb[1].mxu0  ;;  %v240_v7 = vpop.f32.mrb[1].mxu1  ;;  %v387_v8 = vsub.f32 %v42_v0, %v238_v4 }
 0x17e   :  { %v386_v9 = vsub.f32 %v41_v2, %v169_v6  ;;  %v388_v12 = vsub.f32 %v43_v1, %v240_v7 }
 0x17f   :  { %v393_v10 = vmul.f32 %v385_v5, %v385_v5  ;;  %v395_v13 = vmul.f32 %v387_v8, %v387_v8 }
 0x180   :  { %v394_v11 = vmul.f32 %v386_v9, %v386_v9  ;;  %v396_v15 = vmul.f32 %v388_v12, %v388_v12 }
 0x182   :  { %v401_v14 = vadd.f32 %v394_v11, %v393_v10 }
 0x184   :  { %v402_v16 = vadd.f32 %v401_v14, %v395_v13 }
 0x186   :  { %v403_v19 = vadd.f32 %v402_v16, %v396_v15  ;;  %v309_v20 = vpop.f32.mrb[2].mxu0  ;;  %v380_v22 = vpop.f32.mrb[2].mxu1 }
 0x187   :  { %v389_v23 = vsub.f32 %v44_v17, %v309_v20  ;;  %v311_v24 = vpop.f32.mrb[3].mxu0  ;;  %v382_v25 = vpop.f32.mrb[3].mxu1  ;;  %v391_v29 = vsub.f32 %v46_v21, %v380_v22 }
 0x188   :  { %v390_v26 = vsub.f32 %v45_v18, %v311_v24  ;;  %v392_v32 = vsub.f32 %v47_v27, %v382_v25 }
 0x189   :  { %v397_v28 = vmul.f32 %v389_v23, %v389_v23  ;;  %v399_v33 = vmul.f32 %v391_v29, %v391_v29 }
 0x18a   :  { %v398_v30 = vmul.f32 %v390_v26, %v390_v26  ;;  %v400_v35 = vmul.f32 %v392_v32, %v392_v32 }
 0x18b   :  { %v404_v31 = vadd.f32 %v403_v19, %v397_v28 }
 0x18d   :  { %v405_v34 = vadd.f32 %v404_v31, %v398_v30 }
 0x18f   :  { %v406_v36 = vadd.f32 %v405_v34, %v399_v33 }
 0x191   :  { %v407_v37 = vadd.f32 %v406_v36, %v400_v35 }
 0x193   :  { %408 = vadd.xlane.f32.xlu0 %v407_v37 }
 0x220   :  { %v409_v38 = vpop.xlane.xlu0 %408 }
 0x221   :  { %v410_v39 = vmax.f32 %v409_v38, 1e-12 }
 0x223   :  { %v411_v40 = vmin.f32 %v410_v39, 1e+12 }
 0x225   :  { %413 = vst.msk [vmem:[%s587_s3] sm:$0xff] %vm412_vm2, %v411_v40 }
 0x226   :  { %418 = vsyncpa [#allocation3], 1 }
 0x227   :  { %419 = vsyncpa [#allocation5], 1 }

</bundles_post_ra>
